<compile_context>
chip_gen: v5e
topology: v5e:2x2
jax: 0.10.0
libtpu: 0.0.40
codegen_flags: <defaults>
</compile_context>

<pallas_src>
import functools

import jax
import jax.numpy as jnp
from jax.experimental import pallas as pl
from jax.experimental.pallas import tpu as pltpu


def _round_up(x, m):
    return (x + m - 1) // m * m


def _tpu_vmem_capacity_bytes():
    try:
        return int(pltpu.get_tpu_info().vmem_capacity_bytes)
    except Exception:
        return 64 * 1024 * 1024  # conservative fallback (safe on every gen)


def _label_graph_kernel(logits_ref, g_ref, out_ref, loss_ref, *,
                        tau, tile_b, n, valid_b, mask_rows):
    x = logits_ref[...].astype(jnp.float32)                     # (tile_b, n)

    # numerically-stable softmax over the label axis
    m = jnp.max(x, axis=-1, keepdims=True)
    e = jnp.exp(x - m)
    denom = jnp.sum(e, axis=-1, keepdims=True)                  # (tile_b, 1)
    inv = pl.reciprocal(denom, approx=True)                     # EUP vrcp (free slot)
    prob = e * inv
    log_prob = (x - m) - jnp.log(denom)

    # graph smoothing: prob @ G on the MXU (G is VMEM-resident across the grid)
    if g_ref.dtype == jnp.float32:
        # opt-in exact path (multi-pass MXU emulation); the bf16 default is
        # single-pass and easily within tolerance since prob is in [0, 1].
        pg = jnp.dot(prob, g_ref[...], preferred_element_type=jnp.float32,
                     precision=jax.lax.Precision.HIGHEST)
    else:  # bf16 fast path (default)
        pg = jnp.dot(prob.astype(g_ref.dtype), g_ref[...],
                     preferred_element_type=jnp.float32)

    smoothed = (1.0 - tau) * prob + tau * pg
    # NOTE: log() of a non-positive `smoothed` is NaN/-inf for graphs with
    # strongly negative entries — same hazard as the PyTorch module.
    new_logits = jnp.log(smoothed)
    out_ref[...] = new_logits.astype(out_ref.dtype)

    # KL(smoothed.log() || prob) partial sums for this tile, emitted as a
    # dense (8, 128) block; the wrapper finishes sum(...) / B.  Keeps the
    # batch grid axis fully parallel (no cross-tile accumulator).
    contrib = prob * (log_prob - new_logits)                    # (tile_b, n)
    if mask_rows:
        row = jax.lax.broadcasted_iota(jnp.int32, (tile_b, n), 0)
        contrib = jnp.where(row + pl.program_id(0) * tile_b < valid_b,
                            contrib, 0.0)

    # lane reduction: static 128-wide slices -> pure VPU adds (no XLU relayout)
    acc = jnp.zeros((tile_b, 128), jnp.float32)
    n_full = n // 128
    for j in range(n_full):
        acc = acc + contrib[:, j * 128:(j + 1) * 128]
    rem = n - n_full * 128
    if rem:
        acc = acc + jnp.pad(contrib[:, n_full * 128:],
                            ((0, 0), (0, 128 - rem)))

    # sublane reduction: static 8-row groups into one (8, 128) partial
    part = jnp.zeros((8, 128), jnp.float32)
    for s in range(tile_b // 8):
        part = part + acc[s * 8:(s + 1) * 8, :]
    loss_ref[...] = part


def label_graph_forward(logits, G, tau=0.5, *, use_bf16_matmul=True):
    """Returns (new_logits, consistency_loss)."""
    B, N = logits.shape
    assert G.shape == (N, N)
    out_dtype = logits.dtype

    g = G.astype(jnp.bfloat16 if use_bf16_matmul else jnp.float32)

    # ---- VMEM planning (generation-aware) -------------------------------
    vmem_cap = _tpu_vmem_capacity_bytes()            # 64 MiB v7x / 128 MiB v5e,v6e
    vmem_budget = int(vmem_cap * 0.82)               # ~52 MiB / ~105 MiB

    lane_n = _round_up(N, 128)
    g_vmem = _round_up(N, 8) * lane_n * g.dtype.itemsize        # Buffered(1): x1

    def vmem_estimate(tb):
        stream = tb * lane_n * 2 * (logits.dtype.itemsize + out_dtype.itemsize)
        interm = 7 * tb * lane_n * 4                 # e, prob, log_prob, pg, ...
        return g_vmem + stream + interm + 2 * 8 * 128 * 4 + (2 << 20)

    # ---- batch tiling ----------------------------------------------------
    tile_b = min(256, _round_up(max(B, 1), 8))
    if B >= 256 and -(-B // tile_b) < 2:
        # make sure the "parallel" axis has >= 2 tiles (dual-TC on v7x)
        tile_b = _round_up(-(-B // 2), 8)
    while vmem_estimate(tile_b) > vmem_budget and tile_b > 8:
        tile_b = max(8, _round_up(tile_b // 2, 8))

    num_tiles = -(-B // tile_b)
    mask_rows = (B % tile_b) != 0                    # partial last block -> mask loss

    kernel = functools.partial(
        _label_graph_kernel,
        tau=float(tau), tile_b=tile_b, n=N, valid_b=B, mask_rows=mask_rows,
    )

    matmul_passes = 1 if use_bf16_matmul else 6      # bf16 single-pass vs f32 HIGHEST
    io_bytes = (B * N * (logits.dtype.itemsize + out_dtype.itemsize)
                + N * N * g.dtype.itemsize
                + num_tiles * 8 * 128 * 4)

    new_logits, loss_parts = pl.pallas_call(
        kernel,
        grid=(num_tiles,),
        in_specs=[
            # streamed logits, native dtype, last dim = full N (no wrapper pad)
            pl.BlockSpec((tile_b, N), lambda i: (i, 0)),
            # VMEM-resident graph, single-buffered (index never changes)
            pl.BlockSpec((N, N), lambda i: (0, 0),
                         pipeline_mode=pl.Buffered(1)),
        ],
        out_specs=(
            pl.BlockSpec((tile_b, N), lambda i: (i, 0)),
            pl.BlockSpec((8, 128), lambda i: (i, 0)),     # lane-dense loss partials
        ),
        out_shape=(
            jax.ShapeDtypeStruct((B, N), out_dtype),
            jax.ShapeDtypeStruct((num_tiles * 8, 128), jnp.float32),
        ),
        compiler_params=pltpu.CompilerParams(
            dimension_semantics=("parallel",),
            vmem_limit_bytes=max(vmem_budget, 32 * 1024 * 1024),
        ),
        cost_estimate=pl.CostEstimate(
            flops=matmul_passes * 2 * B * N * N + 10 * B * N,
            transcendentals=2 * B * N,
            bytes_accessed=io_bytes,
        ),
    )(logits, g)

    loss = jnp.sum(loss_parts) / B
    return new_logits, loss


def build_label_graph(label_emb_weight):
    """Cosine-similarity label graph with zeroed diagonal (init-time glue)."""
    z = label_emb_weight.astype(jnp.float32)                       # (N, D)
    zn = z / jnp.linalg.norm(z, axis=-1, keepdims=True).clip(1e-12)
    sim = jnp.dot(zn, zn.T, precision=jax.lax.Precision.HIGHEST)   # (N, N)
    sim = sim - jnp.diag(jnp.diag(sim))                            # fill_diagonal_(0)
    return sim


def _reference(logits, G, tau):
    prob = jax.nn.softmax(logits.astype(jnp.float32), axis=-1)
    pg = jnp.dot(prob, G.astype(jnp.float32), precision=jax.lax.Precision.HIGHEST)
    smoothed = (1.0 - tau) * prob + tau * pg
    new_logits = jnp.log(smoothed)
    loss = jnp.sum(prob * (jnp.log(prob) - new_logits)) / logits.shape[0]
    return new_logits, loss


if __name__ == "__main__":
    B, N, D = 8, 128, 32   # batch, num labels, label-embedding dim
    TAU = 0.5

    key = jax.random.PRNGKey(0)
    k_emb, k_logits = jax.random.split(key)

    # Positive synthetic label embeddings -> non-negative cosine graph, so
    # `smoothed` stays strictly positive and log() is finite (the PyTorch
    # module has the same log-of-negative hazard with mixed-sign sims).
    label_emb_weight = jax.random.uniform(
        k_emb, (N, D), dtype=jnp.float32, minval=0.1, maxval=1.0)
    G = build_label_graph(label_emb_weight)

    logits = jax.random.normal(k_logits, (B, N), dtype=jnp.float32)

    ref_logits, ref_loss = _reference(logits, G, TAU)

    # default path: bf16 graph, single-pass MXU matmul
    new_logits, loss = label_graph_forward(logits, G, tau=TAU)
    jax.block_until_ready((new_logits, loss))
    assert new_logits.shape == (B, N)
    assert bool(jnp.all(jnp.isfinite(new_logits)))
    assert jnp.allclose(new_logits, ref_logits, rtol=1e-2, atol=1e-2)
    assert jnp.allclose(loss, ref_loss, rtol=1e-2, atol=1e-2)

    # opt-in exact f32 path
    new_f32, loss_f32 = label_graph_forward(logits, G, tau=TAU,
                                            use_bf16_matmul=False)
    jax.block_until_ready((new_f32, loss_f32))
    assert jnp.allclose(new_f32, ref_logits, rtol=5e-3, atol=5e-3)
    assert jnp.allclose(loss_f32, ref_loss, rtol=5e-3, atol=5e-3)

    print("KERNEL_OK")
</pallas_src>

<mosaic_0001>
module attributes {stable_mosaic.version = 11 : i64} {
  func.func @_label_graph_kernel(%arg0: i32, %arg1: memref<8x128xf32, #tpu.memory_space<vmem>>, %arg2: memref<128x128xbf16, #tpu.memory_space<vmem>>, %arg3: memref<8x128xf32, #tpu.memory_space<vmem>>, %arg4: memref<8x128xf32, #tpu.memory_space<vmem>>) attributes {dimension_semantics = [#tpu.dimension_semantics<parallel>], iteration_bounds = array<i64: 1>, scalar_prefetch = 0 : i64, scratch_operands = 0 : i64, tpu.core_type = #tpu.core_type<tc>, window_params = [{transform_indices = @transform_0, window_bounds = array<i64: 8, 128>}, {pipeline_mode = #tpu.pipeline_mode<synchronous>, transform_indices = @transform_1, window_bounds = array<i64: 128, 128>}, {transform_indices = @transform_2, window_bounds = array<i64: 8, 128>}, {transform_indices = @transform_3, window_bounds = array<i64: 8, 128>}]} {
    %c0 = arith.constant 0 : index
    %c0_0 = arith.constant 0 : index
    %0 = vector.load %arg1[%c0, %c0_0] : memref<8x128xf32, #tpu.memory_space<vmem>>, vector<8x128xf32>
    %cst = arith.constant dense<0xFF800000> : vector<8xf32>
    %1 = vector.multi_reduction <maximumf>, %0, %cst [1] : vector<8x128xf32> to vector<8xf32>
    %2 = vector.shape_cast %1 : vector<8xf32> to vector<8x1xf32>
    %3 = vector.broadcast %2 : vector<8x1xf32> to vector<8x128xf32>
    %4 = arith.subf %0, %3 : vector<8x128xf32>
    %5 = math.exp %4 : vector<8x128xf32>
    %cst_1 = arith.constant dense<0.000000e+00> : vector<8xf32>
    %6 = vector.multi_reduction <add>, %5, %cst_1 [1] : vector<8x128xf32> to vector<8xf32>
    %7 = vector.shape_cast %6 : vector<8xf32> to vector<8x1xf32>
    %8 = tpu.reciprocal %7 {approx = true} : vector<8x1xf32> -> vector<8x1xf32>
    %9 = vector.broadcast %8 : vector<8x1xf32> to vector<8x128xf32>
    %10 = arith.mulf %5, %9 : vector<8x128xf32>
    %11 = vector.broadcast %2 : vector<8x1xf32> to vector<8x128xf32>
    %12 = arith.subf %0, %11 : vector<8x128xf32>
    %13 = math.log %7 : vector<8x1xf32>
    %14 = vector.broadcast %13 : vector<8x1xf32> to vector<8x128xf32>
    %15 = arith.subf %12, %14 : vector<8x128xf32>
    %16 = arith.truncf %10 : vector<8x128xf32> to vector<8x128xbf16>
    %c0_2 = arith.constant 0 : index
    %c0_3 = arith.constant 0 : index
    %17 = vector.load %arg2[%c0_2, %c0_3] : memref<128x128xbf16, #tpu.memory_space<vmem>>, vector<128x128xbf16>
    %cst_4 = arith.constant dense<0.000000e+00> : vector<8x128xf32>
    %18 = tpu.matmul %16, %17, %cst_4 {dimension_numbers = #tpu.dot_dimension_numbers<[1], [0], [0], [1], [0, 0, 1, 1], [], []>} : vector<8x128xbf16>, vector<128x128xbf16>, vector<8x128xf32> -> vector<8x128xf32>
    %cst_5 = arith.constant 5.000000e-01 : f32
    %19 = vector.broadcast %cst_5 : f32 to vector<8x128xf32>
    %20 = arith.mulf %19, %10 : vector<8x128xf32>
    %cst_6 = arith.constant 5.000000e-01 : f32
    %21 = vector.broadcast %cst_6 : f32 to vector<8x128xf32>
    %22 = arith.mulf %21, %18 : vector<8x128xf32>
    %23 = arith.addf %20, %22 : vector<8x128xf32>
    %24 = math.log %23 : vector<8x128xf32>
    %c0_7 = arith.constant 0 : index
    %c0_8 = arith.constant 0 : index
    %25 = vector.load %arg3[%c0_7, %c0_8] : memref<8x128xf32, #tpu.memory_space<vmem>>, vector<8x128xf32>
    tpu.vector_store %arg3[%c0_7, %c0_8], %24 {strides = array<i32>} : memref<8x128xf32, #tpu.memory_space<vmem>>, vector<8x128xf32>,
    %26 = arith.subf %15, %24 : vector<8x128xf32>
    %27 = arith.mulf %10, %26 : vector<8x128xf32>
    %cst_9 = arith.constant 0.000000e+00 : f32
    %28 = vector.broadcast %cst_9 : f32 to vector<8x128xf32>
    %29 = arith.addf %28, %27 : vector<8x128xf32>
    %cst_10 = arith.constant 0.000000e+00 : f32
    %30 = vector.broadcast %cst_10 : f32 to vector<8x128xf32>
    %31 = arith.addf %30, %29 : vector<8x128xf32>
    %c0_11 = arith.constant 0 : index
    %c0_12 = arith.constant 0 : index
    %32 = vector.load %arg4[%c0_11, %c0_12] : memref<8x128xf32, #tpu.memory_space<vmem>>, vector<8x128xf32>
    tpu.vector_store %arg4[%c0_11, %c0_12], %31 {strides = array<i32>} : memref<8x128xf32, #tpu.memory_space<vmem>>, vector<8x128xf32>,
    return
  }
  func.func @transform_0(%arg0: i32) -> (i32, i32) {
    %c0_i32 = arith.constant 0 : i32
    %c0_i32_0 = arith.constant 0 : i32
    return %arg0, %c0_i32 : i32, i32
  }
  func.func @transform_1(%arg0: i32) -> (i32, i32) {
    %c0_i32 = arith.constant 0 : i32
    %c0_i32_0 = arith.constant 0 : i32
    %c0_i32_1 = arith.constant 0 : i32
    return %c0_i32, %c0_i32_0 : i32, i32
  }
  func.func @transform_2(%arg0: i32) -> (i32, i32) {
    %c0_i32 = arith.constant 0 : i32
    %c0_i32_0 = arith.constant 0 : i32
    return %arg0, %c0_i32 : i32, i32
  }
  func.func @transform_3(%arg0: i32) -> (i32, i32) {
    %c0_i32 = arith.constant 0 : i32
    %c0_i32_0 = arith.constant 0 : i32
    return %arg0, %c0_i32 : i32, i32
  }
}

</mosaic_0001>

<bundles_post_ra>
// kernel: tpu_custom_call.1
= control target key start
LH: loop header
LB: loop body
LE: loop exit
PB: predicated region body
PF: predicated region fallthrough
CT: control target
= control target key end

     0   :  { %9 = vsyncpa [#allocation3], 0  ;;  %s377_s0 = inlined_call_operand.hbm [shape: f32[8,128], index: 0, kind: input, shape index: {}]   ;;  %s378_s1 = inlined_call_operand.hbm [shape: bf16[128,128], index: 1, kind: input, shape index: {}]   ;;  %s379_s2 = inlined_call_operand.hbm [shape: f32[8,128], index: 2, kind: output, shape index: {0}]   ;;  %s380_s3 = inlined_call_operand.hbm [shape: f32[8,128], index: 3, kind: output, shape index: {1}]  }
   0x1   :  { %10 = vsyncpa [#allocation6], 0 }
   0x2   :  { %11 = vsyncpa [#allocation4], 0 }
   0x3   :  { %12 = vsyncpa [#allocation9], 0  ;;  %s18_s14 = sshll.u32 %s377_s0, 4  ;;  %s339_s15 = smov [#allocation2]   ;;  %s19_s14 = int_to_ptr.hbm [resolvable:$true] %s18_s14 }
   0x4   :  { %s20_s16 = sshll.u32 %s339_s15, 4  ;;  %s28_s19 = sshll.u32 %s378_s1, 4  ;;  %s21_s16 = int_to_ptr.vmem [resolvable:$true] %s20_s16  ;;  %s29_s19 = int_to_ptr.hbm [resolvable:$true] %s28_s19 }
   0x5   :  { %23 = dma.hbm_to_vmem [thread:$0]  %s19_s14, 128, %s21_s16, [#allocation3]  }
   0x6   :  { %s340_s20 = smov [#allocation5]   ;;  %s341_s22 = smov 64  }
   0x7   :  { %s30_s21 = sshll.u32 %s340_s20, 4  ;;  %s342_s23 = smov 4   ;;  %s31_s21 = int_to_ptr.vmem [resolvable:$true] %s30_s21 }
   0x8   :  { %36 = dma.hbm_to_vmem [thread:$0]  %s29_s19, 1024, %s31_s21, [#allocation6], %s341_s22, %s341_s22, %s342_s23  }
   0x9   :  { %331 = dma.done.wait [#allocation3], 128  }
   0xa   :  { %332 = vsyncadd [#allocation3], 4294967168 }
   0xb   :  { %333 = dma.done.wait [#allocation6], 1024  }
   0xc   :  { %334 = vsyncadd [#allocation6], 4294966272  ;;  %v45_v0 = vld [vmem:[#allocation2] sm:$0xff]  ;;  %v219_v2 = vld [vmem:[#allocation5 + $0x30] sm:$0xff]  ;;  %s343_s0 = smov [#allocation7]   ;;  %s154_s26 = sshll.u32 %s379_s2, 4  ;;  %s155_s26 = int_to_ptr.hbm [resolvable:$true] %s154_s26 }
   0xd   :  { %46 = vmax.xlane.f32.xlu0 %v45_v0  ;;  %v220_v1 = vld [vmem:[#allocation5 + $0x38] sm:$0xff]  ;;  %v218_v3 = vld [vmem:[#allocation5 + $0x28] sm:$0xff]  ;;  %v217_v4 = vld [vmem:[#allocation5 + $0x20] sm:$0xff]  ;;  %s152_s1 = sshll.u32 %s343_s0, 4  ;;  %s344_s27 = smov [#allocation8]   ;;  %s153_s1 = int_to_ptr.vmem [resolvable:$true] %s152_s1 }
   0xe   :  { %123 = vmatpush.bf16.msra.mxu0 %v220_v1  ;;  %v216_v5 = vld [vmem:[#allocation5 + $0x18] sm:$0xff]  ;;  %v215_v10 = vld [vmem:[#allocation5 + $0x10] sm:$0xff]  ;;  %v214_v11 = vld [vmem:[#allocation5 + $0x8] sm:$0xff]  ;;  %s163_s28 = sshll.u32 %s344_s27, 4  ;;  %s165_s4 = sshll.u32 %s380_s3, 4  ;;  %s164_s28 = int_to_ptr.vmem [resolvable:$true] %s163_s28  ;;  %s166_s4 = int_to_ptr.hbm [resolvable:$true] %s165_s4 }
   0xf   :  { %v213_v12 = vld [vmem:[#allocation5] sm:$0xff] }
  0x12   :  { %124 = vmatpush.bf16.msra.mxu0 %v219_v2 }
  0x16   :  { %125 = vmatpush.bf16.msra.mxu0 %v218_v3 }
  0x1a   :  { %126 = vmatpush.bf16.msra.mxu0 %v217_v4 }
  0x1e   :  { %127 = vmatpush.bf16.msra.mxu0 %v216_v5 }
  0x22   :  { %128 = vmatpush.bf16.msra.mxu0 %v215_v10 }
  0x26   :  { %129 = vmatpush.bf16.msra.mxu0 %v214_v11 }
  0x2a   :  { %130 = vmatpush.bf16.msra.mxu0 %v213_v12 }
  0x80   :  { %v47_v6 = vpop.xlane.xlu0 %46 }
  0x81   :  { %v48_v7 = vsub.f32 %v45_v0, %v47_v6 }
  0x83   :  { %v49_v8 = vmul.f32 1.442695, %v48_v7 }
  0x85   :  { %227 = vpow2.f32 %v49_v8 }
  0x8b   :  { %v228_v9 = vpop.eup %227 }
  0x8c   :  { %51 = vadd.xlane.f32.xlu0 %v228_v9 }
  0xff   :  { %v52_v13 = vpop.xlane.xlu0 %51 }
 0x100   :  { %229 = vrcp.f32 %v52_v13 }
 0x101   :  { %231 = vlog2.f32 %v52_v13 }
 0x106   :  { %v230_v14 = vpop.eup %229 }
 0x107   :  { %v54_v15 = vmul.f32 %v230_v14, %v228_v9  ;;  %v232_v21 = vpop.eup %231 }
 0x108   :  { %v56_v22 = vmul.f32 0.6931472, %v232_v21 }
 0x109   :  { %v58_v16 = vpack.c.bf16 %v54_v15, %v54_v15  ;;  %v136_v18 = vmul.f32 0.5, %v54_v15 }
 0x10a   :  { %v57_v25 = vsub.f32 %v48_v7, %v56_v22 }
 0x10b   :  { %131 = vmatmul.bf16.vlgmr.msra.gmra.mxu0 %v58_v16 }
 0x188   :  { %v132_v17 = vpop.f32.mrf.mxu0 }
 0x189   :  { %v137_v19 = vmul.f32 0.5, %v132_v17 }
 0x18b   :  { %v138_v20 = vadd.f32 %v137_v19, %v136_v18 }
 0x18d   :  { %233 = vlog2.f32 %v138_v20 }
 0x190   :  { %v134_v23 = vpop.f32.mrf.mxu0 }
 0x193   :  { %v234_v24 = vpop.eup %233 }
 0x194   :  { %v140_v26 = vmul.f32 0.6931472, %v234_v24 }
 0x196   :  { %v142_v27 = vsub.f32 %v57_v25, %v140_v26  ;;  %141 = vst [vmem:[#allocation7] sm:$0xff] %v140_v26 }
 0x197   :  { %157 = dma.vmem_to_hbm [thread:$0]  %s153_s1, 128, %s155_s26, [#allocation4]  }
 0x198   :  { %v143_v28 = vmul.f32 %v142_v27, %v54_v15 }
 0x19a   :  { %146 = vst [vmem:[#allocation8] sm:$0xff] %v143_v28 }
 0x19b   :  { %168 = dma.vmem_to_hbm [thread:$0]  %s164_s28, 128, %s166_s4, [#allocation9]  }
 0x19c   :  { %335 = dma.done.wait [#allocation4], 128  }
 0x19d   :  { %336 = vsyncadd [#allocation4], 4294967168 }
 0x19e   :  { %337 = dma.done.wait [#allocation9], 128  }
 0x19f   :  { %338 = vsyncadd [#allocation9], 4294967168 }
 0x1a0   :  { %177 = vsyncpa [#allocation3], 1 }
 0x1a1   :  { %178 = vsyncpa [#allocation6], 1 }
 0x1a2   :  { %179 = vsyncpa [#allocation4], 1 }
 0x1a3   :  { %180 = vsyncpa [#allocation9], 1 }

</bundles_post_ra>
